<compile_context>
chip_gen: v7x
topology: tpu7x:2x2x1
jax: 0.10.0
libtpu: 0.0.40
codegen_flags: <defaults>
</compile_context>

<pallas_src>
import functools

import jax
import jax.numpy as jnp
from jax.experimental import pallas as pl
from jax.experimental.pallas import tpu as pltpu


def _round_up(a, b):
    return (a + b - 1) // b * b


def _hwm_ae_kernel(
    x_ref,
    ew1_ref, eb1_ref, ew2_ref, eb2_ref, mzw_ref, mzb_ref,
    dw1_ref, db1_ref, dw2_ref, db2_ref, w34_ref, b34_ref,
    out_ref,
    *, obs_dim,
):
    f32 = jnp.float32
    x = x_ref[...].astype(f32)  # (TM, input_dim); bf16 in HBM, f32 in-register

    # ----- Encoder: fc1 -> relu -> fc2 -> relu -> m_z -----
    h = jnp.dot(x, ew1_ref[...].astype(f32), preferred_element_type=f32) + eb1_ref[...]
    h = jnp.maximum(h, 0.0)
    h = jnp.dot(h, ew2_ref[...].astype(f32), preferred_element_type=f32) + eb2_ref[...]
    h = jnp.maximum(h, 0.0)
    z = jnp.dot(h, mzw_ref[...].astype(f32), preferred_element_type=f32) + mzb_ref[...]

    # ----- Decoder trunk: fc1 -> relu -> fc2 -> relu -----
    g = jnp.dot(z, dw1_ref[...].astype(f32), preferred_element_type=f32) + db1_ref[...]
    g = jnp.maximum(g, 0.0)
    g = jnp.dot(g, dw2_ref[...].astype(f32), preferred_element_type=f32) + db2_ref[...]
    g = jnp.maximum(g, 0.0)

    # ----- Fused decoder tail: one matmul for [fc3 | fc4] -----
    comb = jnp.dot(g, w34_ref[...].astype(f32), preferred_element_type=f32) + b34_ref[...]

    # Softmax only over the act lanes (columns >= obs_dim), numerically stable.
    col = jax.lax.broadcasted_iota(jnp.int32, comb.shape, 1)
    is_act = col >= obs_dim
    masked = jnp.where(is_act, comb, jnp.float32(-1e30))
    m = jnp.max(masked, axis=-1, keepdims=True)
    e = jnp.exp(masked - m)                       # obs lanes -> exp(-huge) = 0
    denom = jnp.sum(e, axis=-1, keepdims=True)
    soft = e * pl.reciprocal(denom, approx=True)  # EUP vrcp; slightly approximate
    obs_act = jnp.where(is_act, soft, comb)

    # Single lane-merged store per tile: [obs | softmax(act) | z].
    out_ref[...] = jnp.concatenate([obs_act, z], axis=-1)


@functools.partial(jax.jit, static_argnames=("tm", "use_bf16"))
def hwm_ae_forward(x, params, tm=1024, use_bf16=True):
    """x: [..., input_dim] float32. Returns (recon_obs, recon_act, z)."""
    (ew1, eb1, ew2, eb2, mzw, mzb,
     dw1, db1, dw2, db2, dw3, db3, dw4, db4) = params

    lead = x.shape[:-1]
    input_dim = x.shape[-1]
    hidden_dim = ew1.shape[1]
    latent_dim = mzw.shape[1]
    obs_dim = dw3.shape[1]
    act_dim = dw4.shape[1]
    out_dim = obs_dim + act_dim + latent_dim

    M = 1
    for d in lead:
        M *= d

    # Row tile: large to amortize ~600-cycle per-grid-step overhead; multiple of
    # 16 for bf16 sublane packing; clamped so tiny inputs still work.  Sweep
    # tm in 512-2048 (bias larger on v7x) for production shapes.
    tm_eff = max(16, min(_round_up(tm, 16), _round_up(M, 16)))
    grid_m = pl.cdiv(M, tm_eff)
    m_pad = grid_m * tm_eff

    x2 = x.reshape(M, input_dim)
    if m_pad != M:
        x2 = jnp.pad(x2, ((0, m_pad - M), (0, 0)))  # padded rows are sliced off below

    # bf16 for the bandwidth-heavy tensors; biases stay f32 (elementwise math is f32).
    w_dtype = jnp.bfloat16 if use_bf16 else jnp.float32
    x2 = x2.astype(w_dtype)
    w34 = jnp.concatenate([dw3, dw4], axis=1).astype(w_dtype)   # fused fc3|fc4
    b34 = jnp.concatenate([db3, db4], axis=1)
    ew1c = ew1.astype(w_dtype)
    ew2c = ew2.astype(w_dtype)
    mzwc = mzw.astype(w_dtype)
    dw1c = dw1.astype(w_dtype)
    dw2c = dw2.astype(w_dtype)

    def full_spec(a):
        # Constant index_map -> block stays resident in VMEM across grid steps.
        return pl.BlockSpec(a.shape, lambda i: (0,) * a.ndim)

    def row_spec(d):
        return pl.BlockSpec((tm_eff, d), lambda i: (i, 0))

    in_arrays = (x2, ew1c, eb1, ew2c, eb2, mzwc, mzb,
                 dw1c, db1, dw2c, db2, w34, b34)
    in_specs = [row_spec(input_dim)] + [full_spec(a) for a in in_arrays[1:]]

    flops = 2 * m_pad * (input_dim * hidden_dim + hidden_dim * hidden_dim
                         + hidden_dim * latent_dim + latent_dim * hidden_dim
                         + hidden_dim * hidden_dim + hidden_dim * (obs_dim + act_dim))
    bytes_accessed = (int(x2.size) * x2.dtype.itemsize
                      + sum(int(a.size) * a.dtype.itemsize for a in in_arrays[1:])
                      + m_pad * out_dim * 4)
    transcendentals = m_pad * (obs_dim + act_dim + 1)

    out = pl.pallas_call(
        functools.partial(_hwm_ae_kernel, obs_dim=obs_dim),
        out_shape=jax.ShapeDtypeStruct((m_pad, out_dim), jnp.float32),
        grid_spec=pltpu.PrefetchScalarGridSpec(
            num_scalar_prefetch=0,
            grid=(grid_m,),
            in_specs=in_specs,
            out_specs=row_spec(out_dim),
        ),
        compiler_params=pltpu.CompilerParams(
            dimension_semantics=("parallel",),  # shards row-tiles across TCs on v7x
        ),
        cost_estimate=pl.CostEstimate(
            flops=flops,
            transcendentals=transcendentals,
            bytes_accessed=bytes_accessed,
        ),
    )(*in_arrays)

    out = out[:M]
    recon_obs = out[:, :obs_dim].reshape(*lead, obs_dim)
    recon_act = out[:, obs_dim:obs_dim + act_dim].reshape(*lead, act_dim)
    z = out[:, obs_dim + act_dim:].reshape(*lead, latent_dim)
    return recon_obs, recon_act, z


def init_params(key, input_dim, latent_dim, hidden_dim, obs_dim, act_dim):
    """PyTorch-style uniform(+-1/sqrt(fan_in)) init. Weights are (in, out); biases (1, out)."""
    def linear(key, fan_in, fan_out):
        kw, kb = jax.random.split(key)
        bound = 1.0 / jnp.sqrt(jnp.float32(fan_in))
        w = jax.random.uniform(kw, (fan_in, fan_out), jnp.float32, -bound, bound)
        b = jax.random.uniform(kb, (1, fan_out), jnp.float32, -bound, bound)
        return w, b

    keys = jax.random.split(key, 7)
    ew1, eb1 = linear(keys[0], input_dim, hidden_dim)   # encoder.fc1
    ew2, eb2 = linear(keys[1], hidden_dim, hidden_dim)  # encoder.fc2
    mzw, mzb = linear(keys[2], hidden_dim, latent_dim)  # encoder.m_z
    dw1, db1 = linear(keys[3], latent_dim, hidden_dim)  # decoder.fc1
    dw2, db2 = linear(keys[4], hidden_dim, hidden_dim)  # decoder.fc2
    dw3, db3 = linear(keys[5], hidden_dim, obs_dim)     # decoder.fc3
    dw4, db4 = linear(keys[6], hidden_dim, act_dim)     # decoder.fc4
    return (ew1, eb1, ew2, eb2, mzw, mzb,
            dw1, db1, dw2, db2, dw3, db3, dw4, db4)


def reference_forward(x, params, precision=jax.lax.Precision.HIGHEST):
    """Pure-JAX reference matching the PyTorch forward."""
    (ew1, eb1, ew2, eb2, mzw, mzb,
     dw1, db1, dw2, db2, dw3, db3, dw4, db4) = params
    dot = lambda a, b: jnp.dot(a, b, precision=precision)
    h = jax.nn.relu(dot(x, ew1) + eb1[0])
    h = jax.nn.relu(dot(h, ew2) + eb2[0])
    z = dot(h, mzw) + mzb[0]
    g = jax.nn.relu(dot(z, dw1) + db1[0])
    g = jax.nn.relu(dot(g, dw2) + db2[0])
    out_obs = dot(g, dw3) + db3[0]
    out_act = jax.nn.softmax(dot(g, dw4) + db4[0], axis=-1)
    return out_obs, out_act, z


def _bf16_round(a):
    return a.astype(jnp.bfloat16).astype(jnp.float32)


def _quantized_params(params):
    """Round the weight matrices (not biases) through bf16, like the kernel sees them."""
    params = list(params)
    for idx in (0, 2, 4, 6, 8, 10, 12):
        params[idx] = _bf16_round(params[idx])
    return tuple(params)


if __name__ == "__main__":
    # Small shapes consistent with the module: x is [B, T, S, input_dim].
    B, T, S = 2, 4, 8
    input_dim, latent_dim, hidden_dim = 16, 8, 32
    obs_dim, act_dim = 12, 4

    key = jax.random.PRNGKey(0)
    kx, kx2, kp = jax.random.split(key, 3)
    x = jax.random.normal(kx, (B, T, S, input_dim), jnp.float32)
    params = init_params(kp, input_dim, latent_dim, hidden_dim, obs_dim, act_dim)

    recon_obs, recon_act, z = hwm_ae_forward(x, params)
    jax.block_until_ready((recon_obs, recon_act, z))

    assert recon_obs.shape == (B, T, S, obs_dim)
    assert recon_act.shape == (B, T, S, act_dim)
    assert z.shape == (B, T, S, latent_dim)

    # (1) Tight check against a reference that consumes the same bf16-rounded
    #     x / weight matrices (matches the kernel's actual arithmetic).
    params_q = _quantized_params(params)
    ro_q, ra_q, z_q = reference_forward(_bf16_round(x), params_q)
    assert jnp.allclose(recon_obs, ro_q, atol=2e-2, rtol=2e-2)
    assert jnp.allclose(recon_act, ra_q, atol=2e-2, rtol=2e-2)
    assert jnp.allclose(z, z_q, atol=2e-2, rtol=2e-2)

    # (2) Semantics check against the exact f32 PyTorch-equivalent forward
    #     (looser tolerance: bf16 input/weight quantization + approx reciprocal).
    ro, ra, zr = reference_forward(x, params)
    assert jnp.allclose(recon_obs, ro, atol=6e-2, rtol=6e-2)
    assert jnp.allclose(recon_act, ra, atol=6e-2, rtol=6e-2)
    assert jnp.allclose(z, zr, atol=6e-2, rtol=6e-2)

    # (3) Exercise the padded / multi-step-grid path (M not a multiple of tm).
    B2, T2, S2 = 2, 3, 7  # M = 42 -> padded to 64 with tm=32, grid of 2 steps
    xr = jax.random.normal(kx2, (B2, T2, S2, input_dim), jnp.float32)
    ro2, ra2, z2 = hwm_ae_forward(xr, params, tm=32)
    jax.block_until_ready((ro2, ra2, z2))
    ro2_q, ra2_q, z2_q = reference_forward(_bf16_round(xr), params_q)
    assert ro2.shape == (B2, T2, S2, obs_dim)
    assert jnp.allclose(ro2, ro2_q, atol=2e-2, rtol=2e-2)
    assert jnp.allclose(ra2, ra2_q, atol=2e-2, rtol=2e-2)
    assert jnp.allclose(z2, z2_q, atol=2e-2, rtol=2e-2)

    print("KERNEL_OK")
</pallas_src>

<mosaic_0001>
module attributes {stable_mosaic.version = 11 : i64} {
  func.func @_hwm_ae_kernel(%arg0: i32, %arg1: memref<64x16xbf16, #tpu.memory_space<vmem>>, %arg2: memref<16x32xbf16, #tpu.memory_space<vmem>>, %arg3: memref<1x32xf32, #tpu.memory_space<vmem>>, %arg4: memref<32x32xbf16, #tpu.memory_space<vmem>>, %arg5: memref<1x32xf32, #tpu.memory_space<vmem>>, %arg6: memref<32x8xbf16, #tpu.memory_space<vmem>>, %arg7: memref<1x8xf32, #tpu.memory_space<vmem>>, %arg8: memref<8x32xbf16, #tpu.memory_space<vmem>>, %arg9: memref<1x32xf32, #tpu.memory_space<vmem>>, %arg10: memref<32x32xbf16, #tpu.memory_space<vmem>>, %arg11: memref<1x32xf32, #tpu.memory_space<vmem>>, %arg12: memref<32x16xbf16, #tpu.memory_space<vmem>>, %arg13: memref<1x16xf32, #tpu.memory_space<vmem>>, %arg14: memref<64x24xf32, #tpu.memory_space<vmem>>) attributes {dimension_semantics = [#tpu.dimension_semantics<parallel>], iteration_bounds = array<i64: 1>, scalar_prefetch = 0 : i64, scratch_operands = 0 : i64, tpu.core_type = #tpu.core_type<tc>, window_params = [{transform_indices = @transform_0, window_bounds = array<i64: 64, 16>}, {pipeline_mode = #tpu.pipeline_mode<synchronous>, transform_indices = @transform_1, window_bounds = array<i64: 16, 32>}, {pipeline_mode = #tpu.pipeline_mode<synchronous>, transform_indices = @transform_2, window_bounds = array<i64: 1, 32>}, {pipeline_mode = #tpu.pipeline_mode<synchronous>, transform_indices = @transform_3, window_bounds = array<i64: 32, 32>}, {pipeline_mode = #tpu.pipeline_mode<synchronous>, transform_indices = @transform_4, window_bounds = array<i64: 1, 32>}, {pipeline_mode = #tpu.pipeline_mode<synchronous>, transform_indices = @transform_5, window_bounds = array<i64: 32, 8>}, {pipeline_mode = #tpu.pipeline_mode<synchronous>, transform_indices = @transform_6, window_bounds = array<i64: 1, 8>}, {pipeline_mode = #tpu.pipeline_mode<synchronous>, transform_indices = @transform_7, window_bounds = array<i64: 8, 32>}, {pipeline_mode = #tpu.pipeline_mode<synchronous>, transform_indices = @transform_8, window_bounds = array<i64: 1, 32>}, {pipeline_mode = #tpu.pipeline_mode<synchronous>, transform_indices = @transform_9, window_bounds = array<i64: 32, 32>}, {pipeline_mode = #tpu.pipeline_mode<synchronous>, transform_indices = @transform_10, window_bounds = array<i64: 1, 32>}, {pipeline_mode = #tpu.pipeline_mode<synchronous>, transform_indices = @transform_11, window_bounds = array<i64: 32, 16>}, {pipeline_mode = #tpu.pipeline_mode<synchronous>, transform_indices = @transform_12, window_bounds = array<i64: 1, 16>}, {transform_indices = @transform_13, window_bounds = array<i64: 64, 24>}]} {
    %c0 = arith.constant 0 : index
    %c0_0 = arith.constant 0 : index
    %0 = vector.load %arg1[%c0, %c0_0] : memref<64x16xbf16, #tpu.memory_space<vmem>>, vector<64x16xbf16>
    %1 = arith.extf %0 : vector<64x16xbf16> to vector<64x16xf32>
    %c0_1 = arith.constant 0 : index
    %c0_2 = arith.constant 0 : index
    %2 = vector.load %arg2[%c0_1, %c0_2] : memref<16x32xbf16, #tpu.memory_space<vmem>>, vector<16x32xbf16>
    %3 = arith.extf %2 : vector<16x32xbf16> to vector<16x32xf32>
    %cst = arith.constant dense<0.000000e+00> : vector<64x32xf32>
    %4 = tpu.matmul %1, %3, %cst {dimension_numbers = #tpu.dot_dimension_numbers<[1], [0], [0], [1], [0, 0, 1, 1], [], []>} : vector<64x16xf32>, vector<16x32xf32>, vector<64x32xf32> -> vector<64x32xf32>
    %c0_3 = arith.constant 0 : index
    %c0_4 = arith.constant 0 : index
    %5 = vector.load %arg3[%c0_3, %c0_4] : memref<1x32xf32, #tpu.memory_space<vmem>>, vector<1x32xf32>
    %6 = vector.broadcast %5 : vector<1x32xf32> to vector<64x32xf32>
    %7 = arith.addf %4, %6 : vector<64x32xf32>
    %cst_5 = arith.constant 0.000000e+00 : f32
    %8 = vector.broadcast %cst_5 : f32 to vector<64x32xf32>
    %9 = arith.maximumf %7, %8 : vector<64x32xf32>
    %c0_6 = arith.constant 0 : index
    %c0_7 = arith.constant 0 : index
    %10 = vector.load %arg4[%c0_6, %c0_7] : memref<32x32xbf16, #tpu.memory_space<vmem>>, vector<32x32xbf16>
    %11 = arith.extf %10 : vector<32x32xbf16> to vector<32x32xf32>
    %cst_8 = arith.constant dense<0.000000e+00> : vector<64x32xf32>
    %12 = tpu.matmul %9, %11, %cst_8 {dimension_numbers = #tpu.dot_dimension_numbers<[1], [0], [0], [1], [0, 0, 1, 1], [], []>} : vector<64x32xf32>, vector<32x32xf32>, vector<64x32xf32> -> vector<64x32xf32>
    %c0_9 = arith.constant 0 : index
    %c0_10 = arith.constant 0 : index
    %13 = vector.load %arg5[%c0_9, %c0_10] : memref<1x32xf32, #tpu.memory_space<vmem>>, vector<1x32xf32>
    %14 = vector.broadcast %13 : vector<1x32xf32> to vector<64x32xf32>
    %15 = arith.addf %12, %14 : vector<64x32xf32>
    %cst_11 = arith.constant 0.000000e+00 : f32
    %16 = vector.broadcast %cst_11 : f32 to vector<64x32xf32>
    %17 = arith.maximumf %15, %16 : vector<64x32xf32>
    %c0_12 = arith.constant 0 : index
    %c0_13 = arith.constant 0 : index
    %18 = vector.load %arg6[%c0_12, %c0_13] : memref<32x8xbf16, #tpu.memory_space<vmem>>, vector<32x8xbf16>
    %19 = arith.extf %18 : vector<32x8xbf16> to vector<32x8xf32>
    %cst_14 = arith.constant dense<0.000000e+00> : vector<64x8xf32>
    %20 = tpu.matmul %17, %19, %cst_14 {dimension_numbers = #tpu.dot_dimension_numbers<[1], [0], [0], [1], [0, 0, 1, 1], [], []>} : vector<64x32xf32>, vector<32x8xf32>, vector<64x8xf32> -> vector<64x8xf32>
    %c0_15 = arith.constant 0 : index
    %c0_16 = arith.constant 0 : index
    %21 = vector.load %arg7[%c0_15, %c0_16] : memref<1x8xf32, #tpu.memory_space<vmem>>, vector<1x8xf32>
    %22 = vector.broadcast %21 : vector<1x8xf32> to vector<64x8xf32>
    %23 = arith.addf %20, %22 : vector<64x8xf32>
    %c0_17 = arith.constant 0 : index
    %c0_18 = arith.constant 0 : index
    %24 = vector.load %arg8[%c0_17, %c0_18] : memref<8x32xbf16, #tpu.memory_space<vmem>>, vector<8x32xbf16>
    %25 = arith.extf %24 : vector<8x32xbf16> to vector<8x32xf32>
    %cst_19 = arith.constant dense<0.000000e+00> : vector<64x32xf32>
    %26 = tpu.matmul %23, %25, %cst_19 {dimension_numbers = #tpu.dot_dimension_numbers<[1], [0], [0], [1], [0, 0, 1, 1], [], []>} : vector<64x8xf32>, vector<8x32xf32>, vector<64x32xf32> -> vector<64x32xf32>
    %c0_20 = arith.constant 0 : index
    %c0_21 = arith.constant 0 : index
    %27 = vector.load %arg9[%c0_20, %c0_21] : memref<1x32xf32, #tpu.memory_space<vmem>>, vector<1x32xf32>
    %28 = vector.broadcast %27 : vector<1x32xf32> to vector<64x32xf32>
    %29 = arith.addf %26, %28 : vector<64x32xf32>
    %cst_22 = arith.constant 0.000000e+00 : f32
    %30 = vector.broadcast %cst_22 : f32 to vector<64x32xf32>
    %31 = arith.maximumf %29, %30 : vector<64x32xf32>
    %c0_23 = arith.constant 0 : index
    %c0_24 = arith.constant 0 : index
    %32 = vector.load %arg10[%c0_23, %c0_24] : memref<32x32xbf16, #tpu.memory_space<vmem>>, vector<32x32xbf16>
    %33 = arith.extf %32 : vector<32x32xbf16> to vector<32x32xf32>
    %cst_25 = arith.constant dense<0.000000e+00> : vector<64x32xf32>
    %34 = tpu.matmul %31, %33, %cst_25 {dimension_numbers = #tpu.dot_dimension_numbers<[1], [0], [0], [1], [0, 0, 1, 1], [], []>} : vector<64x32xf32>, vector<32x32xf32>, vector<64x32xf32> -> vector<64x32xf32>
    %c0_26 = arith.constant 0 : index
    %c0_27 = arith.constant 0 : index
    %35 = vector.load %arg11[%c0_26, %c0_27] : memref<1x32xf32, #tpu.memory_space<vmem>>, vector<1x32xf32>
    %36 = vector.broadcast %35 : vector<1x32xf32> to vector<64x32xf32>
    %37 = arith.addf %34, %36 : vector<64x32xf32>
    %cst_28 = arith.constant 0.000000e+00 : f32
    %38 = vector.broadcast %cst_28 : f32 to vector<64x32xf32>
    %39 = arith.maximumf %37, %38 : vector<64x32xf32>
    %c0_29 = arith.constant 0 : index
    %c0_30 = arith.constant 0 : index
    %40 = vector.load %arg12[%c0_29, %c0_30] : memref<32x16xbf16, #tpu.memory_space<vmem>>, vector<32x16xbf16>
    %41 = arith.extf %40 : vector<32x16xbf16> to vector<32x16xf32>
    %cst_31 = arith.constant dense<0.000000e+00> : vector<64x16xf32>
    %42 = tpu.matmul %39, %41, %cst_31 {dimension_numbers = #tpu.dot_dimension_numbers<[1], [0], [0], [1], [0, 0, 1, 1], [], []>} : vector<64x32xf32>, vector<32x16xf32>, vector<64x16xf32> -> vector<64x16xf32>
    %c0_32 = arith.constant 0 : index
    %c0_33 = arith.constant 0 : index
    %43 = vector.load %arg13[%c0_32, %c0_33] : memref<1x16xf32, #tpu.memory_space<vmem>>, vector<1x16xf32>
    %44 = vector.broadcast %43 : vector<1x16xf32> to vector<64x16xf32>
    %45 = arith.addf %42, %44 : vector<64x16xf32>
    %46 = tpu.iota {dimensions = array<i32: 1>} : vector<64x16xi32>
    %c12_i32 = arith.constant 12 : i32
    %47 = vector.broadcast %c12_i32 : i32 to vector<64x16xi32>
    %48 = arith.cmpi sge, %46, %47 : vector<64x16xi32>
    %cst_34 = arith.constant -1.000000e+30 : f32
    %49 = vector.broadcast %cst_34 : f32 to vector<64x16xf32>
    %50 = arith.select %48, %45, %49 : vector<64x16xi1>, vector<64x16xf32>
    %cst_35 = arith.constant dense<0xFF800000> : vector<64xf32>
    %51 = vector.multi_reduction <maximumf>, %50, %cst_35 [1] : vector<64x16xf32> to vector<64xf32>
    %52 = vector.shape_cast %51 : vector<64xf32> to vector<64x1xf32>
    %53 = vector.broadcast %52 : vector<64x1xf32> to vector<64x16xf32>
    %54 = arith.subf %50, %53 : vector<64x16xf32>
    %55 = math.exp %54 : vector<64x16xf32>
    %cst_36 = arith.constant dense<0.000000e+00> : vector<64xf32>
    %56 = vector.multi_reduction <add>, %55, %cst_36 [1] : vector<64x16xf32> to vector<64xf32>
    %57 = vector.shape_cast %56 : vector<64xf32> to vector<64x1xf32>
    %58 = tpu.reciprocal %57 {approx = true} : vector<64x1xf32> -> vector<64x1xf32>
    %59 = vector.broadcast %58 : vector<64x1xf32> to vector<64x16xf32>
    %60 = arith.mulf %55, %59 : vector<64x16xf32>
    %61 = arith.select %48, %60, %45 : vector<64x16xi1>, vector<64x16xf32>
    %62 = tpu.concatenate %61, %23 in 1 : vector<64x16xf32>, vector<64x8xf32> -> vector<64x24xf32>
    %c0_37 = arith.constant 0 : index
    %c0_38 = arith.constant 0 : index
    %63 = vector.load %arg14[%c0_37, %c0_38] : memref<64x24xf32, #tpu.memory_space<vmem>>, vector<64x24xf32>
    tpu.vector_store %arg14[%c0_37, %c0_38], %62 {strides = array<i32>} : memref<64x24xf32, #tpu.memory_space<vmem>>, vector<64x24xf32>,
    return
  }
  func.func @transform_0(%arg0: i32) -> (i32, i32) {
    %c0_i32 = arith.constant 0 : i32
    %c0_i32_0 = arith.constant 0 : i32
    return %arg0, %c0_i32 : i32, i32
  }
  func.func @transform_1(%arg0: i32) -> (i32, i32) {
    %c0_i32 = arith.constant 0 : i32
    %c0_i32_0 = arith.constant 0 : i32
    %c0_i32_1 = arith.constant 0 : i32
    return %c0_i32, %c0_i32_0 : i32, i32
  }
  func.func @transform_2(%arg0: i32) -> (i32, i32) {
    %c0_i32 = arith.constant 0 : i32
    %c0_i32_0 = arith.constant 0 : i32
    %c0_i32_1 = arith.constant 0 : i32
    return %c0_i32, %c0_i32_0 : i32, i32
  }
  func.func @transform_3(%arg0: i32) -> (i32, i32) {
    %c0_i32 = arith.constant 0 : i32
    %c0_i32_0 = arith.constant 0 : i32
    %c0_i32_1 = arith.constant 0 : i32
    return %c0_i32, %c0_i32_0 : i32, i32
  }
  func.func @transform_4(%arg0: i32) -> (i32, i32) {
    %c0_i32 = arith.constant 0 : i32
    %c0_i32_0 = arith.constant 0 : i32
    %c0_i32_1 = arith.constant 0 : i32
    return %c0_i32, %c0_i32_0 : i32, i32
  }
  func.func @transform_5(%arg0: i32) -> (i32, i32) {
    %c0_i32 = arith.constant 0 : i32
    %c0_i32_0 = arith.constant 0 : i32
    %c0_i32_1 = arith.constant 0 : i32
    return %c0_i32, %c0_i32_0 : i32, i32
  }
  func.func @transform_6(%arg0: i32) -> (i32, i32) {
    %c0_i32 = arith.constant 0 : i32
    %c0_i32_0 = arith.constant 0 : i32
    %c0_i32_1 = arith.constant 0 : i32
    return %c0_i32, %c0_i32_0 : i32, i32
  }
  func.func @transform_7(%arg0: i32) -> (i32, i32) {
    %c0_i32 = arith.constant 0 : i32
    %c0_i32_0 = arith.constant 0 : i32
    %c0_i32_1 = arith.constant 0 : i32
    return %c0_i32, %c0_i32_0 : i32, i32
  }
  func.func @transform_8(%arg0: i32) -> (i32, i32) {
    %c0_i32 = arith.constant 0 : i32
    %c0_i32_0 = arith.constant 0 : i32
    %c0_i32_1 = arith.constant 0 : i32
    return %c0_i32, %c0_i32_0 : i32, i32
  }
  func.func @transform_9(%arg0: i32) -> (i32, i32) {
    %c0_i32 = arith.constant 0 : i32
    %c0_i32_0 = arith.constant 0 : i32
    %c0_i32_1 = arith.constant 0 : i32
    return %c0_i32, %c0_i32_0 : i32, i32
  }
  func.func @transform_10(%arg0: i32) -> (i32, i32) {
    %c0_i32 = arith.constant 0 : i32
    %c0_i32_0 = arith.constant 0 : i32
    %c0_i32_1 = arith.constant 0 : i32
    return %c0_i32, %c0_i32_0 : i32, i32
  }
  func.func @transform_11(%arg0: i32) -> (i32, i32) {
    %c0_i32 = arith.constant 0 : i32
    %c0_i32_0 = arith.constant 0 : i32
    %c0_i32_1 = arith.constant 0 : i32
    return %c0_i32, %c0_i32_0 : i32, i32
  }
  func.func @transform_12(%arg0: i32) -> (i32, i32) {
    %c0_i32 = arith.constant 0 : i32
    %c0_i32_0 = arith.constant 0 : i32
    %c0_i32_1 = arith.constant 0 : i32
    return %c0_i32, %c0_i32_0 : i32, i32
  }
  func.func @transform_13(%arg0: i32) -> (i32, i32) {
    %c0_i32 = arith.constant 0 : i32
    %c0_i32_0 = arith.constant 0 : i32
    return %arg0, %c0_i32 : i32, i32
  }
}

</mosaic_0001>

<bundles_post_ra>
// kernel: hwm_ae_forward.1
= control target key start
LH: loop header
LB: loop body
LE: loop exit
PB: predicated region body
PF: predicated region fallthrough
CT: control target
= control target key end

     0   :  { %vm71_vm0 = vcmask 130048   ;;  %vm224_vm1 = vcmask 261120   ;;  %vm515_vm2 = vcmask 64512   ;;  %vm1088_vm4 = vcmask 195584   ;;  %s1806_s1 = inlined_call_operand.vmem [shape: bf16[16,32], index: 1, kind: input, shape index: {}]   ;;  %s1807_s0 = inlined_call_operand.vmem [shape: bf16[64,16], index: 0, kind: input, shape index: {}]   ;;  %s1808_s3 = inlined_call_operand.vmem [shape: bf16[32,32], index: 3, kind: input, shape index: {}]   ;;  %s1809_s5 = inlined_call_operand.vmem [shape: bf16[32,8], index: 5, kind: input, shape index: {}]   ;;  %s1810_s2 = inlined_call_operand.vmem [shape: f32[1,32], index: 2, kind: input, shape index: {}]   ;;  %s1811_s7 = inlined_call_operand.vmem [shape: bf16[8,32], index: 7, kind: input, shape index: {}]   ;;  %s1812_s4 = inlined_call_operand.vmem [shape: f32[1,32], index: 4, kind: input, shape index: {}]   ;;  %s1813_s9 = inlined_call_operand.vmem [shape: bf16[32,32], index: 9, kind: input, shape index: {}]   ;;  %s1814_s6 = inlined_call_operand.vmem [shape: f32[1,8], index: 6, kind: input, shape index: {}]   ;;  %s1815_s11 = inlined_call_operand.vmem [shape: bf16[32,16], index: 11, kind: input, shape index: {}]   ;;  %s1816_s8 = inlined_call_operand.vmem [shape: f32[1,32], index: 8, kind: input, shape index: {}]   ;;  %s1817_s10 = inlined_call_operand.vmem [shape: f32[1,32], index: 10, kind: input, shape index: {}]   ;;  %s1818_s12 = inlined_call_operand.vmem [shape: f32[1,16], index: 12, kind: input, shape index: {}]   ;;  %s1819_s13 = inlined_call_operand.vmem [shape: f32[64,24], index: 13, kind: output, shape index: {}]  }
   0x1   :  { %v1172_v0 = vld [vmem:[%s1806_s1] sm:$0xff]   ;;  %v1207_v2 = vld [vmem:[%s1807_s0 + $0x8] sm:$0xff]   ;;  %v1208_v7 = vld [vmem:[%s1807_s0 + $0x10] sm:$0xff]  }
   0x2   :  { %v1156_v1 = vld [vmem:[%s1807_s0] sm:$0xff]   ;;  %1392 = vmatprep.subr.bf16.mxu0 %v1172_v0  ;;  %v1161_v6 = vunpack.c.l.bf16 %v1207_v2  ;;  %v1162_v8 = vunpack.c.h.bf16 %v1207_v2  ;;  %v1165_v9 = vunpack.c.l.bf16 %v1208_v7  ;;  %v1209_v10 = vld [vmem:[%s1807_s0 + $0x18] sm:$0xff]   ;;  %v1166_v11 = vunpack.c.h.bf16 %v1208_v7  ;;  %v1210_v14 = vld [vmem:[%s1808_s3 + $0x8] sm:$0xff]  }
   0x3   :  { %v1157_v3 = vunpack.c.l.bf16 %v1156_v1  ;;  %v1158_v4 = vunpack.c.h.bf16 %v1156_v1  ;;  %v1176_v5 = vld [vmem:[%s1808_s3] sm:$0xff]   ;;  %1394 = vmatpush3.bf16.msra.mxu0 %v1172_v0  ;;  %v1169_v12 = vunpack.c.l.bf16 %v1209_v10  ;;  %v1170_v13 = vunpack.c.h.bf16 %v1209_v10  ;;  %v1211_v16 = vld [vmem:[%s1809_s5 + $0x8] sm:$0xff]  }
   0x4   :  { %1396 = vmatprep.subr.bf16.mxu1 %v1176_v5  ;;  %v1184_v15 = vld [vmem:[%s1809_s5] sm:$0xff]  }
   0x5   :  { %1285 = vmatprep.mubr.msk.f32.mxu0 %vm71_vm0, %v1157_v3  ;;  %1398 = vmatpush3.bf16.msra.mxu1 %v1176_v5  ;;  %v1101_v17 = vld [vmem:[%s1810_s2] ss:$0 sm:$0xff] }
   0x6   :  { %1286 = vmatmul.mubr.msk.f32.vlgmr.msra.gmra.mrb[0].mxu0 %vm71_vm0, %v1158_v4  ;;  %1400 = vmatprep.subr.bf16.mxu1 %v1210_v14  ;;  %v506_v42 = vld [vmem:[%s1811_s7] sm:$0xf] }
   0x7   :  { %1288 = vmatprep.mubr.msk.f32.mxu0 %vm71_vm0, %v1161_v6  ;;  %1404 = vmatprep.subr.bf16.mxu0 %v1184_v15  ;;  %v507_v43 = vunpack.c.l.bf16 %v506_v42  ;;  %v1110_v44 = vld [vmem:[%s1812_s4] ss:$0 sm:$0xff]  ;;  %v1212_v6 = vld [vmem:[%s1813_s9 + $0x8] sm:$0xff]  }
   0x8   :  { %1406 = vmatpush3.bf16.msra.mxu0 %v1184_v15  ;;  %v1192_v5 = vld [vmem:[%s1813_s9] sm:$0xff]  }
   0x9   :  { %1402 = vmatpush3.bf16.msra.mxu1 %v1210_v14  ;;  %1408 = vmatprep.subr.bf16.mxu0 %v1211_v16  ;;  %v1119_v7 = vld [vmem:[%s1814_s6] ss:$0 sm:$0xff] }
   0xa   :  { %1289 = vmatmul.mubr.msk.f32.gmra.mrb[2].mxu0 %vm71_vm0, %v1162_v8  ;;  %1337 = vmatprep.subr.mxu1 %v507_v43 }
   0xb   :  { %1291 = vmatprep.mubr.msk.f32.mxu0 %vm71_vm0, %v1165_v9 }
   0xc   :  { %1410 = vmatpush3.bf16.msra.mxu0 %v1211_v16 }
   0xd   :  { %1412 = vmatprep.subr.bf16.mxu0 %v1192_v5 }
   0xe   :  { %1292 = vmatmul.mubr.msk.f32.gmra.mrb[4].mxu0 %vm71_vm0, %v1166_v11 }
   0xf   :  { %1294 = vmatprep.mubr.msk.f32.mxu0 %vm71_vm0, %v1169_v12 }
  0x12   :  { %1295 = vmatmul.mubr.msk.f32.gmra.mrb[6].mxu0 %vm71_vm0, %v1170_v13 }
  0xd9   :  { %v1287_v18 = vpop.f32.mrb[0].mxu0 }
  0xda   :  { %v168_v19 = vadd.f32 %v1287_v18, %v1101_v17  ;;  %v162_v20 = vpop.f32.mrb[1].mxu0 }
  0xdb   :  { %v163_v21 = vadd.f32 %v1101_v17, %v162_v20 }
  0xdc   :  { %v202_v24 = vmax.f32 %v168_v19, 0.0 }
  0xdd   :  { %v201_v22 = vmax.f32 %v163_v21, 0.0  ;;  %v1290_v23 = vpop.f32.mrb[2].mxu0 }
  0xde   :  { %v178_v25 = vadd.f32 %v1290_v23, %v1101_v17  ;;  %v172_v26 = vpop.f32.mrb[3].mxu0 }
  0xdf   :  { %v173_v27 = vadd.f32 %v1101_v17, %v172_v26  ;;  %1305 = vmatprep.mubr.msk.f32.mxu1 %vm224_vm1, %v201_v22  ;;  %v1128_v26 = vld [vmem:[%s1816_s8] ss:$0 sm:$0xff] }
  0xe0   :  { %1306 = vmatmul.mubr.msk.f32.vlgmr.msra.gmra.mrb[0].mxu1 %vm224_vm1, %v202_v24  ;;  %v204_v30 = vmax.f32 %v178_v25, 0.0  ;;  %v1200_v24 = vld [vmem:[%s1815_s11] sm:$0xff]   ;;  %v1213_v25 = vld [vmem:[%s1815_s11 + $0x8] sm:$0xff]  }
  0xe1   :  { %v203_v28 = vmax.f32 %v173_v27, 0.0  ;;  %v1293_v29 = vpop.f32.mrb[4].mxu0  ;;  %1338 = vmatpush3.msra.mxu1 %v507_v43 }
  0xe2   :  { %v188_v31 = vadd.f32 %v1293_v29, %v1101_v17  ;;  %v182_v32 = vpop.f32.mrb[5].mxu0  ;;  %1420 = vmatprep.subr.bf16.mxu1 %v1200_v24 }
  0xe3   :  { %v183_v33 = vadd.f32 %v1101_v17, %v182_v32  ;;  %1308 = vmatprep.mubr.msk.f32.mxu1 %vm224_vm1, %v203_v28 }
  0xe4   :  { %v206_v34 = vmax.f32 %v188_v31, 0.0  ;;  %1309 = vmatmul.mubr.msk.f32.gmra.mrb[2].mxu1 %vm224_vm1, %v204_v30 }
  0xe5   :  { %v205_v35 = vmax.f32 %v183_v33, 0.0  ;;  %v1296_v36 = vpop.f32.mrb[6].mxu0 }
  0xe6   :  { %v198_v37 = vadd.f32 %v1296_v36, %v1101_v17  ;;  %v192_v38 = vpop.f32.mrb[7].mxu0 }
  0xe7   :  { %v193_v39 = vadd.f32 %v1101_v17, %v192_v38  ;;  %1311 = vmatprep.mubr.msk.f32.mxu1 %vm224_vm1, %v205_v35 }
  0xe8   :  { %v208_v40 = vmax.f32 %v198_v37, 0.0  ;;  %1312 = vmatmul.mubr.msk.f32.gmra.mrb[4].mxu1 %vm224_vm1, %v206_v34 }
  0xe9   :  { %v207_v41 = vmax.f32 %v193_v39, 0.0 }
  0xeb   :  { %1314 = vmatprep.mubr.msk.f32.mxu1 %vm224_vm1, %v207_v41 }
  0xec   :  { %1315 = vmatmul.mubr.msk.f32.gmra.mrb[6].mxu1 %vm224_vm1, %v208_v40 }
 0x1b3   :  { %v1307_v45 = vpop.f32.mrb[0].mxu1 }
 0x1b4   :  { %v321_v46 = vadd.f32 %v1307_v45, %v1110_v44  ;;  %v315_v47 = vpop.f32.mrb[1].mxu1 }
 0x1b5   :  { %v316_v48 = vadd.f32 %v1110_v44, %v315_v47 }
 0x1b6   :  { %v355_v51 = vmax.f32 %v321_v46, 0.0 }
 0x1b7   :  { %v354_v49 = vmax.f32 %v316_v48, 0.0  ;;  %v1310_v50 = vpop.f32.mrb[2].mxu1 }
 0x1b8   :  { %v331_v52 = vadd.f32 %v1310_v50, %v1110_v44  ;;  %v325_v53 = vpop.f32.mrb[3].mxu1 }
 0x1b9   :  { %v326_v54 = vadd.f32 %v1110_v44, %v325_v53  ;;  %1325 = vmatprep.mubr.msk.f32.mxu0 %vm224_vm1, %v354_v49 }
 0x1ba   :  { %1326 = vmatmul.mubr.msk.f32.vlgmr.msra.gmra.mrb[8].mxu0 %vm224_vm1, %v355_v51  ;;  %v357_v57 = vmax.f32 %v331_v52, 0.0  ;;  %v1137_v51 = vld [vmem:[%s1817_s10] ss:$0 sm:$0xff] }
 0x1bb   :  { %v356_v55 = vmax.f32 %v326_v54, 0.0  ;;  %v1313_v56 = vpop.f32.mrb[4].mxu1  ;;  %1414 = vmatpush3.bf16.msra.mxu0 %v1192_v5 }
 0x1bc   :  { %v341_v58 = vadd.f32 %v1313_v56, %v1110_v44  ;;  %v335_v59 = vpop.f32.mrb[5].mxu1  ;;  %1416 = vmatprep.subr.bf16.mxu0 %v1212_v6 }
 0x1bd   :  { %v336_v60 = vadd.f32 %v1110_v44, %v335_v59  ;;  %1328 = vmatprep.mubr.msk.f32.mxu0 %vm224_vm1, %v356_v55 }
 0x1be   :  { %v359_v61 = vmax.f32 %v341_v58, 0.0  ;;  %1329 = vmatmul.mubr.msk.f32.gmra.mrb[10].mxu0 %vm224_vm1, %v357_v57 }
 0x1bf   :  { %v358_v62 = vmax.f32 %v336_v60, 0.0  ;;  %v1316_v63 = vpop.f32.mrb[6].mxu1  ;;  %1418 = vmatpush3.bf16.msra.mxu0 %v1212_v6 }
 0x1c0   :  { %v351_v0 = vadd.f32 %v1316_v63, %v1110_v44  ;;  %v345_v1 = vpop.f32.mrb[7].mxu1 }
 0x1c1   :  { %v346_v2 = vadd.f32 %v1110_v44, %v345_v1  ;;  %1331 = vmatprep.mubr.msk.f32.mxu0 %vm224_vm1, %v358_v62 }
 0x1c2   :  { %v361_v3 = vmax.f32 %v351_v0, 0.0  ;;  %1332 = vmatmul.mubr.msk.f32.gmra.mrb[12].mxu0 %vm224_vm1, %v359_v61 }
 0x1c3   :  { %v360_v4 = vmax.f32 %v346_v2, 0.0 }
 0x1c5   :  { %1334 = vmatprep.mubr.msk.f32.mxu0 %vm224_vm1, %v360_v4 }
 0x1c6   :  { %1335 = vmatmul.mubr.msk.f32.gmra.mrb[14].mxu0 %vm224_vm1, %v361_v3 }
 0x28d   :  { %v1327_v8 = vpop.f32.mrb[8].mxu0 }
 0x28e   :  { %v467_v9 = vpop.f32.mrb[9].mxu0  ;;  %v1602_v11 = vadd.f32 %v1327_v8, %v1119_v7 }
 0x28f   :  { %v1600_v10 = vadd.f32 %v1119_v7, %v467_v9 }
 0x291   :  { %v1330_v12 = vpop.f32.mrb[10].mxu0  ;;  %1339 = vmatprep.mubr.msk.f32.mxu1 %vm515_vm2, %v1600_v10 }
 0x292   :  { %v477_v13 = vpop.f32.mrb[11].mxu0  ;;  %1340 = vmatmul.mubr.msk.f32.vlgmr.msra.gmra.mrb[8].mxu1 %vm515_vm2, %v1602_v11  ;;  %v1610_v15 = vadd.f32 %v1330_v12, %v1119_v7 }
 0x293   :  { %v1608_v14 = vadd.f32 %v1119_v7, %v477_v13  ;;  %1422 = vmatpush3.bf16.msra.mxu1 %v1200_v24 }
 0x294   :  { %1424 = vmatprep.subr.bf16.mxu1 %v1213_v25 }
 0x295   :  { %v1333_v16 = vpop.f32.mrb[12].mxu0  ;;  %1342 = vmatprep.mubr.msk.f32.mxu1 %vm515_vm2, %v1608_v14 }
 0x296   :  { %v487_v17 = vpop.f32.mrb[13].mxu0  ;;  %1343 = vmatmul.mubr.msk.f32.gmra.mrb[10].mxu1 %vm515_vm2, %v1610_v15  ;;  %v1618_v19 = vadd.f32 %v1333_v16, %v1119_v7  ;;  %v949_v16 = vlaneseq }
 0x297   :  { %v1616_v18 = vadd.f32 %v1119_v7, %v487_v17  ;;  %1426 = vmatpush3.bf16.msra.mxu1 %v1213_v25 }
 0x298   :  { %v1660_v17 = vand.u32 127, %v949_v16 }
 0x299   :  { %v1336_v20 = vpop.f32.mrb[14].mxu0  ;;  %1345 = vmatprep.mubr.msk.f32.mxu1 %vm515_vm2, %v1616_v18 }
 0x29a   :  { %v497_v21 = vpop.f32.mrb[15].mxu0  ;;  %1346 = vmatmul.mubr.msk.f32.gmra.mrb[12].mxu1 %vm515_vm2, %v1618_v19  ;;  %v1626_v23 = vadd.f32 %v1336_v20, %v1119_v7  ;;  %v1146_v20 = vld [vmem:[%s1818_s12] ss:$0 sm:$0xff]  ;;  %vm951_vm3 = vcmp.ge.s32.totalorder %v1660_v17, 12  ;;  %s1460_s12 = smov 16  }
 0x29b   :  { %v1624_v22 = vadd.f32 %v1119_v7, %v497_v21 }
 0x29d   :  { %1348 = vmatprep.mubr.msk.f32.mxu1 %vm515_vm2, %v1624_v22 }
 0x29e   :  { %1349 = vmatmul.mubr.msk.f32.gmra.mrb[14].mxu1 %vm515_vm2, %v1626_v23 }
 0x365   :  { %v1341_v27 = vpop.f32.mrb[8].mxu1 }
 0x366   :  { %v612_v28 = vadd.f32 %v1341_v27, %v1128_v26  ;;  %v606_v29 = vpop.f32.mrb[9].mxu1 }
 0x367   :  { %v607_v30 = vadd.f32 %v1128_v26, %v606_v29 }
 0x368   :  { %v646_v33 = vmax.f32 %v612_v28, 0.0 }
 0x369   :  { %v645_v31 = vmax.f32 %v607_v30, 0.0  ;;  %v1344_v32 = vpop.f32.mrb[10].mxu1 }
 0x36a   :  { %v622_v34 = vadd.f32 %v1344_v32, %v1128_v26  ;;  %v616_v35 = vpop.f32.mrb[11].mxu1 }
 0x36b   :  { %v617_v36 = vadd.f32 %v1128_v26, %v616_v35  ;;  %1359 = vmatprep.mubr.msk.f32.mxu0 %vm224_vm1, %v645_v31 }
 0x36c   :  { %1360 = vmatmul.mubr.msk.f32.vlgmr.msra.gmra.mrb[16].mxu0 %vm224_vm1, %v646_v33  ;;  %v648_v39 = vmax.f32 %v622_v34, 0.0 }
 0x36d   :  { %v647_v37 = vmax.f32 %v617_v36, 0.0  ;;  %v1347_v38 = vpop.f32.mrb[12].mxu1 }
 0x36e   :  { %v632_v40 = vadd.f32 %v1347_v38, %v1128_v26  ;;  %v626_v41 = vpop.f32.mrb[13].mxu1 }
 0x36f   :  { %v627_v42 = vadd.f32 %v1128_v26, %v626_v41  ;;  %1362 = vmatprep.mubr.msk.f32.mxu0 %vm224_vm1, %v647_v37 }
 0x370   :  { %1363 = vmatmul.mubr.msk.f32.gmra.mrb[18].mxu0 %vm224_vm1, %v648_v39  ;;  %v650_v45 = vmax.f32 %v632_v40, 0.0 }
 0x371   :  { %v649_v43 = vmax.f32 %v627_v42, 0.0  ;;  %v1350_v44 = vpop.f32.mrb[14].mxu1 }
 0x372   :  { %v642_v46 = vadd.f32 %v1350_v44, %v1128_v26  ;;  %v636_v47 = vpop.f32.mrb[15].mxu1 }
 0x373   :  { %v637_v48 = vadd.f32 %v1128_v26, %v636_v47  ;;  %1365 = vmatprep.mubr.msk.f32.mxu0 %vm224_vm1, %v649_v43 }
 0x374   :  { %1366 = vmatmul.mubr.msk.f32.gmra.mrb[20].mxu0 %vm224_vm1, %v650_v45  ;;  %v652_v50 = vmax.f32 %v642_v46, 0.0 }
 0x375   :  { %v651_v49 = vmax.f32 %v637_v48, 0.0 }
 0x377   :  { %1368 = vmatprep.mubr.msk.f32.mxu0 %vm224_vm1, %v651_v49 }
 0x378   :  { %1369 = vmatmul.mubr.msk.f32.gmra.mrb[22].mxu0 %vm224_vm1, %v652_v50 }
 0x43f   :  { %v1361_v52 = vpop.f32.mrb[16].mxu0 }
 0x440   :  { %v764_v53 = vadd.f32 %v1361_v52, %v1137_v51  ;;  %v758_v54 = vpop.f32.mrb[17].mxu0 }
 0x441   :  { %v759_v55 = vadd.f32 %v1137_v51, %v758_v54 }
 0x442   :  { %v798_v58 = vmax.f32 %v764_v53, 0.0 }
 0x443   :  { %v797_v56 = vmax.f32 %v759_v55, 0.0  ;;  %v1364_v57 = vpop.f32.mrb[18].mxu0 }
 0x444   :  { %v774_v59 = vadd.f32 %v1364_v57, %v1137_v51  ;;  %v768_v60 = vpop.f32.mrb[19].mxu0 }
 0x445   :  { %v769_v61 = vadd.f32 %v1137_v51, %v768_v60  ;;  %1379 = vmatprep.mubr.msk.f32.mxu1 %vm224_vm1, %v797_v56 }
 0x446   :  { %1380 = vmatmul.mubr.msk.f32.vlgmr.msra.gmra.mrb[16].mxu1 %vm224_vm1, %v798_v58  ;;  %v800_v0 = vmax.f32 %v774_v59, 0.0 }
 0x447   :  { %v799_v62 = vmax.f32 %v769_v61, 0.0  ;;  %v1367_v63 = vpop.f32.mrb[20].mxu0 }
 0x448   :  { %v784_v1 = vadd.f32 %v1367_v63, %v1137_v51  ;;  %v778_v2 = vpop.f32.mrb[21].mxu0 }
 0x449   :  { %v779_v3 = vadd.f32 %v1137_v51, %v778_v2  ;;  %1382 = vmatprep.mubr.msk.f32.mxu1 %vm224_vm1, %v799_v62 }
 0x44a   :  { %1383 = vmatmul.mubr.msk.f32.gmra.mrb[18].mxu1 %vm224_vm1, %v800_v0  ;;  %v802_v6 = vmax.f32 %v784_v1, 0.0 }
 0x44b   :  { %v801_v4 = vmax.f32 %v779_v3, 0.0  ;;  %v1370_v5 = vpop.f32.mrb[22].mxu0 }
 0x44c   :  { %v794_v7 = vadd.f32 %v1370_v5, %v1137_v51  ;;  %v788_v8 = vpop.f32.mrb[23].mxu0 }
 0x44d   :  { %v789_v9 = vadd.f32 %v1137_v51, %v788_v8  ;;  %1385 = vmatprep.mubr.msk.f32.mxu1 %vm224_vm1, %v801_v4 }
 0x44e   :  { %1386 = vmatmul.mubr.msk.f32.gmra.mrb[20].mxu1 %vm224_vm1, %v802_v6  ;;  %v804_v13 = vmax.f32 %v794_v7, 0.0 }
 0x44f   :  { %v803_v12 = vmax.f32 %v789_v9, 0.0 }
 0x451   :  { %1388 = vmatprep.mubr.msk.f32.mxu1 %vm224_vm1, %v803_v12 }
 0x452   :  { %1389 = vmatmul.mubr.msk.f32.gmra.mrb[22].mxu1 %vm224_vm1, %v804_v13 }
 0x519   :  { %v1381_v21 = vpop.f32.mrb[16].mxu1 }
 0x51a   :  { %v1666_v24 = vadd.f32 %v1381_v21, %v1146_v20  ;;  %v910_v25 = vpop.f32.mrb[17].mxu1 }
 0x51b   :  { %v1668_v26 = vadd.f32 %v1146_v20, %v910_v25 }
 0x51c   :  { %v953_v27 = vsel %vm951_vm3, %v1666_v24, -1e+30 }
 0x51d   :  { %v1384_v28 = vpop.f32.mrb[18].mxu1  ;;  %v963_v29 = vsel %vm71_vm0, %v953_v27, -inf  ;;  %v952_v32 = vsel %vm951_vm3, %v1668_v26, -1e+30 }
 0x51e   :  { %v1674_v30 = vadd.f32 %v1384_v28, %v1146_v20  ;;  %964 = vmax.xlane.f32.xlu0 %v963_v29  ;;  %v920_v31 = vpop.f32.mrb[19].mxu1  ;;  %v960_v37 = vsel %vm71_vm0, %v952_v32, -inf }
 0x51f   :  { %v1679_v33 = vadd.f32 %v1146_v20, %v920_v31 }
 0x520   :  { %v955_v34 = vsel %vm951_vm3, %v1674_v30, -1e+30 }
 0x521   :  { %v1387_v35 = vpop.f32.mrb[20].mxu1  ;;  %v969_v36 = vsel %vm71_vm0, %v955_v34, -inf  ;;  %v954_v40 = vsel %vm951_vm3, %v1679_v33, -1e+30 }
 0x522   :  { %v1686_v38 = vadd.f32 %v1387_v35, %v1146_v20  ;;  %970 = vmax.xlane.f32.xlu1 %v969_v36  ;;  %v930_v39 = vpop.f32.mrb[21].mxu1  ;;  %961 = vmax.xlane.f32.xlu0 %v960_v37  ;;  %v966_v43 = vsel %vm71_vm0, %v954_v40, -inf }
 0x523   :  { %v1691_v41 = vadd.f32 %v1146_v20, %v930_v39 }
 0x524   :  { %v957_v48 = vsel %vm951_vm3, %v1686_v38, -1e+30 }
 0x525   :  { %v1390_v42 = vpop.f32.mrb[22].mxu1  ;;  %v956_v44 = vsel %vm951_vm3, %v1691_v41, -1e+30  ;;  %v975_v50 = vsel %vm71_vm0, %v957_v48, -inf }
 0x526   :  { %v1697_v45 = vadd.f32 %v1390_v42, %v1146_v20  ;;  %v940_v46 = vpop.f32.mrb[23].mxu1  ;;  %967 = vmax.xlane.f32.xlu1 %v966_v43  ;;  %v972_v47 = vsel %vm71_vm0, %v956_v44, -inf }
 0x527   :  { %v1703_v49 = vadd.f32 %v1146_v20, %v940_v46  ;;  %973 = vmax.xlane.f32.xlu0 %v972_v47 }
 0x528   :  { %v959_v53 = vsel %vm951_vm3, %v1697_v45, -1e+30 }
 0x529   :  { %v958_v51 = vsel %vm951_vm3, %v1703_v49, -1e+30  ;;  %v981_v54 = vsel %vm71_vm0, %v959_v53, -inf }
 0x52a   :  { %976 = vmax.xlane.f32.xlu1 %v975_v50  ;;  %v978_v52 = vsel %vm71_vm0, %v958_v51, -inf }
 0x52b   :  { %979 = vmax.xlane.f32.xlu0 %v978_v52 }
 0x52e   :  { %982 = vmax.xlane.f32.xlu1 %v981_v54 }
 0x53f   :  { %1058 = vrot.lane.b32.xlu1 %v1602_v11, %s1460_s12 }
 0x541   :  { %1056 = vrot.lane.b32.xlu0 %v1600_v10, %s1460_s12 }
 0x543   :  { %1060 = vrot.lane.b32.xlu1 %v1608_v14, %s1460_s12 }
 0x545   :  { %1064 = vrot.lane.b32.xlu0 %v1616_v18, %s1460_s12 }
 0x547   :  { %1062 = vrot.lane.b32.xlu1 %v1610_v15, %s1460_s12 }
 0x54b   :  { %1066 = vrot.lane.b32.xlu1 %v1618_v19, %s1460_s12 }
 0x5ab   :  { %v965_v55 = vpop.xlane.xlu0 %964 }
 0x5ac   :  { %v985_v56 = vsub.f32 %v953_v27, %v965_v55 }
 0x5ae   :  { %v994_v57 = vmul.f32 1.442695, %v985_v56 }
 0x5af   :  { %v971_v58 = vpop.xlane.xlu1 %970  ;;  %v962_v11 = vpop.xlane.xlu0 %961 }
 0x5b0   :  { %1428 = vpow2.f32 %v994_v57  ;;  %v987_v59 = vsub.f32 %v955_v34, %v971_v58  ;;  %v984_v10 = vsub.f32 %v952_v32, %v962_v11 }
 0x5b2   :  { %v998_v60 = vmul.f32 1.442695, %v987_v59  ;;  %v992_v61 = vmul.f32 1.442695, %v984_v10 }
 0x5b3   :  { %v968_v14 = vpop.xlane.xlu1 %967 }
 0x5b4   :  { %1430 = vpow2.f32 %v998_v60  ;;  %v986_v62 = vsub.f32 %v954_v40, %v968_v14  ;;  %v974_v18 = vpop.xlane.xlu0 %973 }
 0x5b5   :  { %1432 = vpow2.f32 %v992_v61  ;;  %v988_v63 = vsub.f32 %v956_v44, %v974_v18 }
 0x5b6   :  { %v996_v15 = vmul.f32 1.442695, %v986_v62 }
 0x5b7   :  { %v1000_v0 = vmul.f32 1.442695, %v988_v63  ;;  %v977_v1 = vpop.xlane.xlu1 %976 }
 0x5b8   :  { %1434 = vpow2.f32 %v996_v15  ;;  %v989_v19 = vsub.f32 %v957_v48, %v977_v1  ;;  %v980_v2 = vpop.xlane.xlu0 %979 }
 0x5b9   :  { %v990_v3 = vsub.f32 %v958_v51, %v980_v2  ;;  %1436 = vpow2.f32 %v1000_v0 }
 0x5ba   :  { %v1429_v4 = vpop.eup %1428  ;;  %v1002_v5 = vmul.f32 1.442695, %v989_v19 }
 0x5bb   :  { %v1004_v6 = vmul.f32 1.442695, %v990_v3  ;;  %v983_v7 = vpop.xlane.xlu1 %982  ;;  %v1011_v8 = vsel %vm71_vm0, %v1429_v4, 0.0 }
 0x5bc   :  { %1438 = vpow2.f32 %v1002_v5  ;;  %v991_v9 = vsub.f32 %v959_v53, %v983_v7  ;;  %1012 = vadd.xlane.f32.xlu1 %v1011_v8  ;;  %v1057_v43 = vpop.permute.xlu0 %1056 }
 0x5bd   :  { %1440 = vpow2.f32 %v1004_v6 }
 0x5be   :  { %v1431_v12 = vpop.eup %1430  ;;  %v1006_v13 = vmul.f32 1.442695, %v991_v9 }
 0x5bf   :  { %v1433_v16 = vpop.eup %1432  ;;  %v1017_v20 = vsel %vm71_vm0, %v1431_v12, 0.0  ;;  %v1059_v39 = vpop.permute.xlu1 %1058 }
 0x5c0   :  { %1442 = vpow2.f32 %v1006_v13  ;;  %1018 = vadd.xlane.f32.xlu1 %v1017_v20  ;;  %v1008_v21 = vsel %vm71_vm0, %v1433_v16, 0.0  ;;  %v1065_v47 = vpop.permute.xlu0 %1064 }
 0x5c1   :  { %1009 = vadd.xlane.f32.xlu0 %v1008_v21 }
 0x5c2   :  { %v1435_v25 = vpop.eup %1434 }
 0x5c3   :  { %v1014_v27 = vsel %vm71_vm0, %v1435_v25, 0.0  ;;  %v1437_v28 = vpop.eup %1436  ;;  %v1061_v40 = vpop.permute.xlu1 %1060 }
 0x5c4   :  { %v1020_v32 = vsel %vm71_vm0, %v1437_v28, 0.0 }
 0x5c5   :  { %1015 = vadd.xlane.f32.xlu0 %v1014_v27 }
 0x5c6   :  { %v1439_v29 = vpop.eup %1438 }
 0x5c7   :  { %v1023_v31 = vsel %vm71_vm0, %v1439_v29, 0.0  ;;  %v1732_v34 = vpop.eup %1440  ;;  %v1063_v42 = vpop.permute.xlu1 %1062 }
 0x5c8   :  { %1024 = vadd.xlane.f32.xlu1 %v1023_v31  ;;  %v1026_v37 = vsel %vm71_vm0, %v1732_v34, 0.0 }
 0x5c9   :  { %1021 = vadd.xlane.f32.xlu0 %v1020_v32 }
 0x5ca   :  { %v1443_v35 = vpop.eup %1442 }
 0x5cb   :  { %v1029_v36 = vsel %vm71_vm0, %v1443_v35, 0.0  ;;  %v1067_v44 = vpop.permute.xlu1 %1066 }
 0x5cc   :  { %1030 = vadd.xlane.f32.xlu1 %v1029_v36 }
 0x5cd   :  { %1027 = vadd.xlane.f32.xlu0 %v1026_v37 }
 0x5dd   :  { %1070 = vrot.lane.b32.xlu1 %v1626_v23, %s1460_s12 }
 0x5e3   :  { %1068 = vrot.lane.b32.xlu0 %v1624_v22, %s1460_s12 }
 0x649   :  { %v1013_v46 = vpop.xlane.xlu1 %1012 }
 0x64a   :  { %1444 = vrcp.f32 %v1013_v46 }
 0x64d   :  { %v1019_v48 = vpop.xlane.xlu1 %1018 }
 0x64e   :  { %1446 = vrcp.f32 %v1019_v48  ;;  %v1010_v50 = vpop.xlane.xlu0 %1009 }
 0x64f   :  { %1448 = vrcp.f32 %v1010_v50 }
 0x652   :  { %v1016_v51 = vpop.xlane.xlu0 %1015 }
 0x653   :  { %1450 = vrcp.f32 %v1016_v51 }
 0x654   :  { %v1445_v52 = vpop.eup %1444 }
 0x655   :  { %v1041_v53 = vmul.f32 %v1445_v52, %v1429_v4  ;;  %v1025_v23 = vpop.xlane.xlu1 %1024 }
 0x656   :  { %1452 = vrcp.f32 %v1025_v23  ;;  %v1022_v54 = vpop.xlane.xlu0 %1021 }
 0x657   :  { %v1049_v22 = vsel %vm951_vm3, %v1041_v53, %v1666_v24  ;;  %1454 = vrcp.f32 %v1022_v54 }
 0x658   :  { %v1447_v55 = vpop.eup %1446  ;;  %v1081_v56 = vsel %vm71_vm0, %v1049_v22, %v1059_v39 }
 0x659   :  { %v1449_v57 = vpop.eup %1448  ;;  %v1043_v58 = vmul.f32 %v1447_v55, %v1431_v12  ;;  %v1031_v11 = vpop.xlane.xlu1 %1030  ;;  %1090 = vst.msk [vmem:[%s1819_s13 + $0x8] sm:$0xff] %vm1088_vm4, %v1081_v56 }
 0x65a   :  { %v1040_v59 = vmul.f32 %v1449_v57, %v1433_v16  ;;  %1456 = vrcp.f32 %v1031_v11  ;;  %v1028_v10 = vpop.xlane.xlu0 %1027 }
 0x65b   :  { %v1051_v60 = vsel %vm951_vm3, %v1043_v58, %v1674_v30  ;;  %1458 = vrcp.f32 %v1028_v10 }
 0x65c   :  { %v1083_v24 = vsel %vm71_vm0, %v1051_v60, %v1063_v42  ;;  %v1048_v61 = vsel %vm951_vm3, %v1040_v59, %v1668_v26 }
 0x65d   :  { %v1451_v14 = vpop.eup %1450  ;;  %v1080_v62 = vsel %vm71_vm0, %v1048_v61, %v1057_v43  ;;  %1092 = vst.msk [vmem:[%s1819_s13 + $0x18] sm:$0xff] %vm1088_vm4, %v1083_v24  ;;  %v1071_v7 = vpop.permute.xlu1 %1070 }
 0x65e   :  { %v1042_v18 = vmul.f32 %v1451_v14, %v1435_v25  ;;  %1089 = vst.msk [vmem:[%s1819_s13] sm:$0xff] %vm1088_vm4, %v1080_v62  ;;  %v1069_v12 = vpop.permute.xlu0 %1068 }
 0x660   :  { %v1453_v30 = vpop.eup %1452  ;;  %v1050_v63 = vsel %vm951_vm3, %v1042_v18, %v1679_v33 }
 0x661   :  { %v1455_v26 = vpop.eup %1454  ;;  %v1082_v15 = vsel %vm71_vm0, %v1050_v63, %v1061_v40  ;;  %v1045_v0 = vmul.f32 %v1453_v30, %v1439_v29 }
 0x662   :  { %v1044_v1 = vmul.f32 %v1455_v26, %v1437_v28  ;;  %1091 = vst.msk [vmem:[%s1819_s13 + $0x10] sm:$0xff] %vm1088_vm4, %v1082_v15 }
 0x663   :  { %v1053_v19 = vsel %vm951_vm3, %v1045_v0, %v1686_v38 }
 0x664   :  { %v1457_v2 = vpop.eup %1456  ;;  %v1085_v3 = vsel %vm71_vm0, %v1053_v19, %v1067_v44  ;;  %v1052_v33 = vsel %vm951_vm3, %v1044_v1, %v1691_v41 }
 0x665   :  { %v1459_v4 = vpop.eup %1458  ;;  %v1084_v5 = vsel %vm71_vm0, %v1052_v33, %v1065_v47  ;;  %v1047_v6 = vmul.f32 %v1457_v2, %v1443_v35  ;;  %1094 = vst.msk [vmem:[%s1819_s13 + $0x28] sm:$0xff] %vm1088_vm4, %v1085_v3 }
 0x666   :  { %1093 = vst.msk [vmem:[%s1819_s13 + $0x20] sm:$0xff] %vm1088_vm4, %v1084_v5  ;;  %v1046_v38 = vmul.f32 %v1459_v4, %v1732_v34 }
 0x667   :  { %v1055_v41 = vsel %vm951_vm3, %v1047_v6, %v1697_v45 }
 0x668   :  { %v1087_v8 = vsel %vm71_vm0, %v1055_v41, %v1071_v7  ;;  %v1054_v9 = vsel %vm951_vm3, %v1046_v38, %v1703_v49 }
 0x669   :  { %1096 = vst.msk [vmem:[%s1819_s13 + $0x38] sm:$0xff] %vm1088_vm4, %v1087_v8  ;;  %v1086_v13 = vsel %vm71_vm0, %v1054_v9, %v1069_v12 }
 0x66a   :  { %1095 = vst.msk [vmem:[%s1819_s13 + $0x30] sm:$0xff] %vm1088_vm4, %v1086_v13 }

</bundles_post_ra>
